<compile_context>
chip_gen: v6e
topology: v6e:2x2x1
jax: 0.10.0
libtpu: 0.0.40
codegen_flags: <defaults>
</compile_context>

<pallas_src>
import functools

import jax
import jax.numpy as jnp
from jax import lax
from jax.experimental import pallas as pl
from jax.experimental.pallas import tpu as pltpu

BN_EPS = 1e-5
LEAKY_SLOPE = 0.1


def _round_up(a, b):
    return (a + b - 1) // b * b


def _pick_tm(m):
    """M tile: large (fewer grid steps), multiple of 256 (v6e/v7x MXU) and 128 (v5e)."""
    if m < 256:
        return _round_up(m, 8)
    for cand in (1024, 512, 256):
        if m >= cand and (_round_up(m, cand) - m) * 8 <= m:  # <= 12.5% padding
            return cand
    return 256


def _pick_k(k):
    """K padding + per-grid-step K chunk.

    Prefer 256-aligned K (v6e/v7x MXU width) when the extra zero columns are cheap;
    keep the whole reduction inside ONE grid step whenever it fits (k_pad <= 2048),
    so the f32 accumulator is not bounced through VMEM per K step (MRB-friendly on
    v7x).  v5e's 128-wide MXU is fine with 128 multiples.
    """
    k_pad = _round_up(k, 128)
    k256 = _round_up(k, 256)
    if k_pad % 256 != 0 and (k256 - k_pad) * 100 <= 15 * k_pad:
        k_pad = k256
    if k_pad <= 2048:
        return k_pad, k_pad
    for cand in (2048, 1024, 512, 256, 128):
        if k_pad % cand == 0:
            return k_pad, cand
    return k_pad, 128


def _pick_phase2_cols(m_pad, c_sub):
    """Phase-2 lane-dense block width: ~2-4 MiB of double-buffered in+out tiles."""
    budget = (4 << 20) // (c_sub * (2 + 4) * 2)
    if m_pad <= max(budget, 256):
        return m_pad
    for cand in (32768, 16384, 8192, 4096, 2048, 1024, 512, 256, 128):
        if cand <= budget and m_pad % cand == 0:
            return cand
    return 128


# ----------------------------------------------------------------------------
# Phase 1: tiled matmul (conv as channel-major im2col) + per-M-tile BN partials
# ----------------------------------------------------------------------------
def _conv_stats_kernel(p_ref, w_ref, o_ref, sum_ref, ssq_ref, acc_ref,
                       *, c_sub, tk, nk, w_resident):
    # p_ref : (tk, tm)            bf16  im2col patch chunk (K x M layout)
    # w_ref : (c_pad, k_pad|tk)   bf16  weight (VMEM-resident when w_resident)
    # o_ref : (c_sub, tm)         bf16  conv intermediate, M on the lane axis
    # sum_ref/ssq_ref : (1, c_pad, 1) f32 per-M-tile stat partials
    # acc_ref : (c_pad, tm)       f32   MXU accumulator scratch
    ki = pl.program_id(1)

    @pl.when(ki == 0)
    def _():
        acc_ref[...] = jnp.zeros_like(acc_ref)

    if w_resident and nk > 1:
        # Whole weight resident in VMEM (constant block index); slice this K chunk.
        k0 = pl.multiple_of(ki * tk, tk)
        w = w_ref[:, pl.ds(k0, tk)]
    else:
        w = w_ref[...]

    acc_ref[...] += jnp.dot(w, p_ref[...], preferred_element_type=jnp.float32)

    @pl.when(ki == nk - 1)
    def _():
        x = acc_ref[...]                                    # (c_pad, tm) f32
        # Per-M-tile partial stats from the f32 accumulator (cross-lane XLU
        # reductions; this kernel is HBM-bound, so the XLU slot has slack).
        sum_ref[0] = jnp.sum(x, axis=1, keepdims=True)      # (c_pad, 1)
        ssq_ref[0] = jnp.sum(x * x, axis=1, keepdims=True)
        # Only the real (sublane-padded) channels reach HBM, in bf16, lane-dense.
        o_ref[...] = x[:c_sub, :].astype(o_ref.dtype)       # (c_sub, tm)


# ----------------------------------------------------------------------------
# Phase 2: BatchNorm (precomputed per-channel scale/shift) + LeakyReLU(0.1)
# ----------------------------------------------------------------------------
def _bn_act_kernel(x_ref, scale_ref, shift_ref, o_ref):
    # x: (c_sub, tc) bf16; scale/shift: (c_sub, 1) f32 broadcast along lanes.
    y = x_ref[...].astype(jnp.float32) * scale_ref[...] + shift_ref[...]
    o_ref[...] = jnp.maximum(y, LEAKY_SLOPE * y)  # LeakyReLU(0.1), f32, lane-dense


# ----------------------------------------------------------------------------
# Glue: bf16 channel-major im2col + parameter reshaping + pallas_call wrappers
# ----------------------------------------------------------------------------
def _im2col_km(x_nchw, kh, kw, stride, pad):
    """bf16 NCHW input -> im2col patches in channel-major (K, M) layout.

    K ordering: (tap_i, tap_j, c_in) [matches the weight reshape below];
    M ordering: (n, ho, wo).
    """
    n, c, h, w = x_nchw.shape
    xp = jnp.pad(x_nchw, ((0, 0), (0, 0), (pad, pad), (pad, pad)))
    ho = (h + 2 * pad - kh) // stride + 1
    wo = (w + 2 * pad - kw) // stride + 1
    xt = jnp.transpose(xp, (1, 0, 2, 3))  # (C, N, Hp, Wp)
    rows = []
    for i in range(kh):
        for j in range(kw):
            sl = xt[:, :,
                    i: i + (ho - 1) * stride + 1: stride,
                    j: j + (wo - 1) * stride + 1: stride]   # (C, N, Ho, Wo)
            rows.append(sl.reshape(c, n * ho * wo))
    return jnp.concatenate(rows, axis=0), (n, ho, wo)        # (kh*kw*C, M)


@functools.partial(jax.jit, static_argnames=("stride", "padding"))
def cnn_block_forward(x_nchw, conv_w, bn_gamma, bn_beta, *, stride=1, padding=1):
    """x: (N, C_in, H, W); conv_w: (C_out, C_in, KH, KW) OIHW. Returns NCHW f32."""
    c_out, c_in, kh, kw = conv_w.shape

    # bf16 patches, built once, directly in the channel-major layout.
    pkm, (n, ho, wo) = _im2col_km(
        x_nchw.astype(jnp.bfloat16), kh, kw, stride, padding)
    k, m = pkm.shape

    tm = _pick_tm(m)
    m_pad = _round_up(m, tm)
    k_pad, tk = _pick_k(k)
    c_pad = _round_up(c_out, 128)  # MXU-width channel padding (VMEM / acc only)
    c_sub = _round_up(c_out, 8)    # channel padding that actually reaches HBM
    nm, nk = m_pad // tm, k_pad // tk

    p = jnp.pad(pkm, ((0, k_pad - k), (0, m_pad - m)))              # (k_pad, m_pad) bf16
    w2 = jnp.transpose(conv_w, (0, 2, 3, 1)).reshape(c_out, k)
    w2 = jnp.pad(w2.astype(jnp.bfloat16),
                 ((0, c_pad - c_out), (0, k_pad - k)))              # (c_pad, k_pad) bf16

    # Weight stays VMEM-resident (constant block index -> fetched once) when it fits.
    w_resident = c_pad * k_pad * 2 <= (8 << 20)
    if w_resident:
        w_spec = pl.BlockSpec((c_pad, k_pad), lambda i, j: (0, 0))
    else:
        w_spec = pl.BlockSpec((c_pad, tk), lambda i, j: (0, j))

    # Double-buffer-aware VMEM budget + headroom, clamped for v7x's 64 MiB VMEM.
    p1_est = (2 * tk * tm * 2
              + 2 * c_pad * (k_pad if w_resident else tk) * 2
              + 2 * c_sub * tm * 2
              + 2 * 2 * c_pad * 4
              + c_pad * tm * 4)
    vmem1 = min(int(p1_est * 1.5) + (8 << 20), 64 << 20)

    conv_flops = 2 * m_pad * k_pad * c_pad
    conv_bytes = (k_pad * m_pad * 2
                  + c_pad * k_pad * 2 * (1 if w_resident else nm)
                  + c_sub * m_pad * 2
                  + 2 * nm * c_pad * 4)

    conv_cm, part_sum, part_ssq = pl.pallas_call(
        functools.partial(_conv_stats_kernel, c_sub=c_sub, tk=tk, nk=nk,
                          w_resident=w_resident),
        out_shape=(
            jax.ShapeDtypeStruct((c_sub, m_pad), jnp.bfloat16),  # conv intermediate
            jax.ShapeDtypeStruct((nm, c_pad, 1), jnp.float32),   # per-M-tile sum
            jax.ShapeDtypeStruct((nm, c_pad, 1), jnp.float32),   # per-M-tile sumsq
        ),
        grid_spec=pltpu.PrefetchScalarGridSpec(
            num_scalar_prefetch=0,
            grid=(nm, nk),
            in_specs=[
                pl.BlockSpec((tk, tm), lambda i, j: (j, i)),
                w_spec,
            ],
            out_specs=[
                pl.BlockSpec((c_sub, tm), lambda i, j: (0, i)),
                pl.BlockSpec((1, c_pad, 1), lambda i, j: (i, 0, 0)),
                pl.BlockSpec((1, c_pad, 1), lambda i, j: (i, 0, 0)),
            ],
            scratch_shapes=[pltpu.VMEM((c_pad, tm), jnp.float32)],
        ),
        compiler_params=pltpu.CompilerParams(
            # Per-M-tile partial stats -> M axis is safely "parallel" (v7x megacore);
            # K is the reduction axis -> "arbitrary".
            dimension_semantics=("parallel", "arbitrary"),
            vmem_limit_bytes=vmem1,
        ),
        cost_estimate=pl.CostEstimate(
            flops=conv_flops, transcendentals=0, bytes_accessed=conv_bytes),
    )(p, w2)

    # Per-channel BN coefficients (tiny per-channel math, plain JAX, f32).
    # Padded M columns / padded channels contribute exactly 0 -> divide by real m.
    ch_sum = jnp.sum(part_sum[:, :, 0], axis=0)
    ch_ssq = jnp.sum(part_ssq[:, :, 0], axis=0)
    inv_m = 1.0 / float(m)
    mean = ch_sum * inv_m
    var = jnp.maximum(ch_ssq * inv_m - mean * mean, 0.0)  # biased batch variance
    inv_std = lax.rsqrt(var + BN_EPS)
    gamma = jnp.zeros((c_pad,), jnp.float32).at[:c_out].set(bn_gamma.astype(jnp.float32))
    beta = jnp.zeros((c_pad,), jnp.float32).at[:c_out].set(bn_beta.astype(jnp.float32))
    scale = (gamma * inv_std)[:c_sub].reshape(c_sub, 1)
    shift = (beta - mean * gamma * inv_std)[:c_sub].reshape(c_sub, 1)

    # Phase 2: y = x*scale + shift, LeakyReLU(0.1); large lane-dense streaming blocks.
    tc2 = _pick_phase2_cols(m_pad, c_sub)
    p2_est = 2 * c_sub * tc2 * (2 + 4) + 4 * c_sub * 4
    vmem2 = min(int(p2_est * 1.5) + (8 << 20), 64 << 20)

    out_cm = pl.pallas_call(
        _bn_act_kernel,
        out_shape=jax.ShapeDtypeStruct((c_sub, m_pad), jnp.float32),
        grid_spec=pltpu.PrefetchScalarGridSpec(
            num_scalar_prefetch=0,
            grid=(m_pad // tc2,),
            in_specs=[
                pl.BlockSpec((c_sub, tc2), lambda i: (0, i)),
                pl.BlockSpec((c_sub, 1), lambda i: (0, 0)),
                pl.BlockSpec((c_sub, 1), lambda i: (0, 0)),
            ],
            out_specs=pl.BlockSpec((c_sub, tc2), lambda i: (0, i)),
        ),
        compiler_params=pltpu.CompilerParams(
            dimension_semantics=("parallel",),
            vmem_limit_bytes=vmem2,
        ),
    )(conv_cm, scale, shift)

    # (c_sub, m_pad) -> (N, C_out, Ho, Wo): slice away padding, reorder to NCHW.
    out = out_cm[:c_out, :m].reshape(c_out, n, ho, wo)
    return jnp.transpose(out, (1, 0, 2, 3))


# ----------------------------------------------------------------------------
# Pure-JAX reference (mirrors the PyTorch module in training mode, f32)
# ----------------------------------------------------------------------------
def reference_forward(x_nchw, conv_w, bn_gamma, bn_beta, *, stride=1, padding=1):
    y = lax.conv_general_dilated(
        x_nchw,
        conv_w,
        window_strides=(stride, stride),
        padding=((padding, padding), (padding, padding)),
        dimension_numbers=("NCHW", "OIHW", "NCHW"),
    )
    mean = jnp.mean(y, axis=(0, 2, 3), keepdims=True)
    var = jnp.mean((y - mean) ** 2, axis=(0, 2, 3), keepdims=True)  # biased
    yn = (y - mean) * lax.rsqrt(var + BN_EPS)
    yn = yn * bn_gamma.reshape(1, -1, 1, 1) + bn_beta.reshape(1, -1, 1, 1)
    return jnp.where(yn >= 0, yn, LEAKY_SLOPE * yn)


if __name__ == "__main__":
    # shapes consistent with CNNBlock(in_channels=4, out_channels=8,
    # kernel_size=3, stride=1, padding=1)
    key = jax.random.PRNGKey(0)
    kx, kw_, kg, kb = jax.random.split(key, 4)

    N, C_IN, H, W = 2, 4, 16, 16
    C_OUT, KH, KW = 8, 3, 3

    x = jax.random.normal(kx, (N, C_IN, H, W), dtype=jnp.float32)
    conv_w = 0.1 * jax.random.normal(kw_, (C_OUT, C_IN, KH, KW), dtype=jnp.float32)
    bn_gamma = 1.0 + 0.05 * jax.random.normal(kg, (C_OUT,), dtype=jnp.float32)
    bn_beta = 0.05 * jax.random.normal(kb, (C_OUT,), dtype=jnp.float32)

    out = cnn_block_forward(x, conv_w, bn_gamma, bn_beta, stride=1, padding=1)
    out = jax.block_until_ready(out)

    ref = reference_forward(x, conv_w, bn_gamma, bn_beta, stride=1, padding=1)
    assert out.shape == (N, C_OUT, H, W), out.shape
    max_err = float(jnp.max(jnp.abs(out - ref)))
    # bf16 MXU operands + bf16 conv intermediate vs f32 reference -> relaxed tol.
    assert jnp.allclose(out, ref, atol=5e-2, rtol=5e-2), max_err

    print("KERNEL_OK")
</pallas_src>

<mosaic_0001>
module attributes {stable_mosaic.version = 11 : i64} {
  func.func @_conv_stats_kernel(%arg0: i32, %arg1: i32, %arg2: memref<128x512xbf16, #tpu.memory_space<vmem>>, %arg3: memref<128x128xbf16, #tpu.memory_space<vmem>>, %arg4: memref<8x512xbf16, #tpu.memory_space<vmem>>, %arg5: memref<1x128x1xf32, #tpu.memory_space<vmem>>, %arg6: memref<1x128x1xf32, #tpu.memory_space<vmem>>, %arg7: memref<128x512xf32, #tpu.memory_space<vmem>>) attributes {dimension_semantics = [#tpu.dimension_semantics<parallel>, #tpu.dimension_semantics<arbitrary>], iteration_bounds = array<i64: 1, 1>, scalar_prefetch = 0 : i64, scratch_operands = 1 : i64, tpu.core_type = #tpu.core_type<tc>, window_params = [{transform_indices = @transform_0, window_bounds = array<i64: 128, 512>}, {pipeline_mode = #tpu.pipeline_mode<synchronous>, transform_indices = @transform_1, window_bounds = array<i64: 128, 128>}, {transform_indices = @transform_2, window_bounds = array<i64: 8, 512>}, {transform_indices = @transform_3, window_bounds = array<i64: 1, 128, 1>}, {transform_indices = @transform_4, window_bounds = array<i64: 1, 128, 1>}]} {
    %c0_i32 = arith.constant 0 : i32
    %0 = arith.cmpi eq, %arg1, %c0_i32 : i32
    %1 = arith.extui %0 : i1 to i32
    %c0_i32_0 = arith.constant 0 : i32
    %2 = arith.cmpi ne, %1, %c0_i32_0 : i32
    scf.if %2 {
      %cst_10 = arith.constant 0.000000e+00 : f32
      %12 = vector.broadcast %cst_10 : f32 to vector<128x512xf32>
      %c0_11 = arith.constant 0 : index
      %c0_12 = arith.constant 0 : index
      %13 = vector.load %arg7[%c0_11, %c0_12] : memref<128x512xf32, #tpu.memory_space<vmem>>, vector<128x512xf32>
      tpu.vector_store %arg7[%c0_11, %c0_12], %12 {strides = array<i32>} : memref<128x512xf32, #tpu.memory_space<vmem>>, vector<128x512xf32>,
    } else {
    }
    %c0 = arith.constant 0 : index
    %c0_1 = arith.constant 0 : index
    %3 = vector.load %arg3[%c0, %c0_1] : memref<128x128xbf16, #tpu.memory_space<vmem>>, vector<128x128xbf16>
    %c0_2 = arith.constant 0 : index
    %c0_3 = arith.constant 0 : index
    %4 = vector.load %arg7[%c0_2, %c0_3] : memref<128x512xf32, #tpu.memory_space<vmem>>, vector<128x512xf32>
    %c0_4 = arith.constant 0 : index
    %c0_5 = arith.constant 0 : index
    %5 = vector.load %arg2[%c0_4, %c0_5] : memref<128x512xbf16, #tpu.memory_space<vmem>>, vector<128x512xbf16>
    %cst = arith.constant dense<0.000000e+00> : vector<128x512xf32>
    %6 = tpu.matmul %3, %5, %cst {dimension_numbers = #tpu.dot_dimension_numbers<[1], [0], [0], [1], [0, 0, 1, 1], [], []>} : vector<128x128xbf16>, vector<128x512xbf16>, vector<128x512xf32> -> vector<128x512xf32>
    %7 = arith.addf %4, %6 : vector<128x512xf32>
    %c0_6 = arith.constant 0 : index
    %c0_7 = arith.constant 0 : index
    %8 = vector.load %arg7[%c0_6, %c0_7] : memref<128x512xf32, #tpu.memory_space<vmem>>, vector<128x512xf32>
    tpu.vector_store %arg7[%c0_6, %c0_7], %7 {strides = array<i32>} : memref<128x512xf32, #tpu.memory_space<vmem>>, vector<128x512xf32>,
    %c0_i32_8 = arith.constant 0 : i32
    %9 = arith.cmpi eq, %arg1, %c0_i32_8 : i32
    %10 = arith.extui %9 : i1 to i32
    %c0_i32_9 = arith.constant 0 : i32
    %11 = arith.cmpi ne, %10, %c0_i32_9 : i32
    scf.if %11 {
      %c0_10 = arith.constant 0 : index
      %c0_11 = arith.constant 0 : index
      %12 = vector.load %arg7[%c0_10, %c0_11] : memref<128x512xf32, #tpu.memory_space<vmem>>, vector<128x512xf32>
      %cst_12 = arith.constant dense<0.000000e+00> : vector<128xf32>
      %13 = vector.multi_reduction <add>, %12, %cst_12 [1] : vector<128x512xf32> to vector<128xf32>
      %14 = vector.shape_cast %13 : vector<128xf32> to vector<128x1xf32>
      %c0_13 = arith.constant 0 : index
      %c0_14 = arith.constant 0 : index
      %c0_15 = arith.constant 0 : index
      %15 = vector.load %arg5[%c0_13, %c0_14, %c0_15] : memref<1x128x1xf32, #tpu.memory_space<vmem>>, vector<1x128x1xf32>
      %16 = vector.shape_cast %15 : vector<1x128x1xf32> to vector<128x1xf32>
      %17 = vector.shape_cast %14 : vector<128x1xf32> to vector<1x128x1xf32>
      tpu.vector_store %arg5[%c0_13, %c0_14, %c0_15], %17 {strides = array<i32>} : memref<1x128x1xf32, #tpu.memory_space<vmem>>, vector<1x128x1xf32>,
      %18 = arith.mulf %12, %12 : vector<128x512xf32>
      %cst_16 = arith.constant dense<0.000000e+00> : vector<128xf32>
      %19 = vector.multi_reduction <add>, %18, %cst_16 [1] : vector<128x512xf32> to vector<128xf32>
      %20 = vector.shape_cast %19 : vector<128xf32> to vector<128x1xf32>
      %c0_17 = arith.constant 0 : index
      %c0_18 = arith.constant 0 : index
      %c0_19 = arith.constant 0 : index
      %21 = vector.load %arg6[%c0_17, %c0_18, %c0_19] : memref<1x128x1xf32, #tpu.memory_space<vmem>>, vector<1x128x1xf32>
      %22 = vector.shape_cast %21 : vector<1x128x1xf32> to vector<128x1xf32>
      %23 = vector.shape_cast %20 : vector<128x1xf32> to vector<1x128x1xf32>
      tpu.vector_store %arg6[%c0_17, %c0_18, %c0_19], %23 {strides = array<i32>} : memref<1x128x1xf32, #tpu.memory_space<vmem>>, vector<1x128x1xf32>,
      %24 = vector.extract_strided_slice %12 {offsets = [0, 0], sizes = [8, 512], strides = [1, 1]} : vector<128x512xf32> to vector<8x512xf32>
      %25 = arith.truncf %24 : vector<8x512xf32> to vector<8x512xbf16>
      %c0_20 = arith.constant 0 : index
      %c0_21 = arith.constant 0 : index
      %26 = vector.load %arg4[%c0_20, %c0_21] : memref<8x512xbf16, #tpu.memory_space<vmem>>, vector<8x512xbf16>
      tpu.vector_store %arg4[%c0_20, %c0_21], %25 {strides = array<i32>} : memref<8x512xbf16, #tpu.memory_space<vmem>>, vector<8x512xbf16>,
    } else {
    }
    return
  }
  func.func @transform_0(%arg0: i32, %arg1: i32) -> (i32, i32) {
    %c0_i32 = arith.constant 0 : i32
    return %arg1, %arg0 : i32, i32
  }
  func.func @transform_1(%arg0: i32, %arg1: i32) -> (i32, i32) {
    %c0_i32 = arith.constant 0 : i32
    %c0_i32_0 = arith.constant 0 : i32
    %c0_i32_1 = arith.constant 0 : i32
    return %c0_i32, %c0_i32_0 : i32, i32
  }
  func.func @transform_2(%arg0: i32, %arg1: i32) -> (i32, i32) {
    %c0_i32 = arith.constant 0 : i32
    %c0_i32_0 = arith.constant 0 : i32
    return %c0_i32, %arg0 : i32, i32
  }
  func.func @transform_3(%arg0: i32, %arg1: i32) -> (i32, i32, i32) {
    %c0_i32 = arith.constant 0 : i32
    %c0_i32_0 = arith.constant 0 : i32
    %c0_i32_1 = arith.constant 0 : i32
    return %arg0, %c0_i32, %c0_i32_0 : i32, i32, i32
  }
  func.func @transform_4(%arg0: i32, %arg1: i32) -> (i32, i32, i32) {
    %c0_i32 = arith.constant 0 : i32
    %c0_i32_0 = arith.constant 0 : i32
    %c0_i32_1 = arith.constant 0 : i32
    return %arg0, %c0_i32, %c0_i32_0 : i32, i32, i32
  }
}

module attributes {stable_mosaic.version = 11 : i64} {
  func.func @_bn_act_kernel(%arg0: i32, %arg1: memref<8x512xbf16, #tpu.memory_space<vmem>>, %arg2: memref<8x1xf32, #tpu.memory_space<vmem>>, %arg3: memref<8x1xf32, #tpu.memory_space<vmem>>, %arg4: memref<8x512xf32, #tpu.memory_space<vmem>>) attributes {dimension_semantics = [#tpu.dimension_semantics<parallel>], iteration_bounds = array<i64: 1>, scalar_prefetch = 0 : i64, scratch_operands = 0 : i64, tpu.core_type = #tpu.core_type<tc>, window_params = [{transform_indices = @transform_0, window_bounds = array<i64: 8, 512>}, {pipeline_mode = #tpu.pipeline_mode<synchronous>, transform_indices = @transform_1, window_bounds = array<i64: 8, 1>}, {pipeline_mode = #tpu.pipeline_mode<synchronous>, transform_indices = @transform_2, window_bounds = array<i64: 8, 1>}, {transform_indices = @transform_3, window_bounds = array<i64: 8, 512>}]} {
    %c0 = arith.constant 0 : index
    %c0_0 = arith.constant 0 : index
    %0 = vector.load %arg1[%c0, %c0_0] : memref<8x512xbf16, #tpu.memory_space<vmem>>, vector<8x512xbf16>
    %1 = arith.extf %0 : vector<8x512xbf16> to vector<8x512xf32>
    %c0_1 = arith.constant 0 : index
    %c0_2 = arith.constant 0 : index
    %2 = vector.load %arg2[%c0_1, %c0_2] : memref<8x1xf32, #tpu.memory_space<vmem>>, vector<8x1xf32>
    %3 = vector.broadcast %2 : vector<8x1xf32> to vector<8x512xf32>
    %4 = arith.mulf %1, %3 : vector<8x512xf32>
    %c0_3 = arith.constant 0 : index
    %c0_4 = arith.constant 0 : index
    %5 = vector.load %arg3[%c0_3, %c0_4] : memref<8x1xf32, #tpu.memory_space<vmem>>, vector<8x1xf32>
    %6 = vector.broadcast %5 : vector<8x1xf32> to vector<8x512xf32>
    %7 = arith.addf %4, %6 : vector<8x512xf32>
    %cst = arith.constant 1.000000e-01 : f32
    %8 = vector.broadcast %cst : f32 to vector<8x512xf32>
    %9 = arith.mulf %8, %7 : vector<8x512xf32>
    %10 = arith.maximumf %7, %9 : vector<8x512xf32>
    %c0_5 = arith.constant 0 : index
    %c0_6 = arith.constant 0 : index
    %11 = vector.load %arg4[%c0_5, %c0_6] : memref<8x512xf32, #tpu.memory_space<vmem>>, vector<8x512xf32>
    tpu.vector_store %arg4[%c0_5, %c0_6], %10 {strides = array<i32>} : memref<8x512xf32, #tpu.memory_space<vmem>>, vector<8x512xf32>,
    return
  }
  func.func @transform_0(%arg0: i32) -> (i32, i32) {
    %c0_i32 = arith.constant 0 : i32
    %c0_i32_0 = arith.constant 0 : i32
    return %c0_i32, %arg0 : i32, i32
  }
  func.func @transform_1(%arg0: i32) -> (i32, i32) {
    %c0_i32 = arith.constant 0 : i32
    %c0_i32_0 = arith.constant 0 : i32
    %c0_i32_1 = arith.constant 0 : i32
    return %c0_i32, %c0_i32_0 : i32, i32
  }
  func.func @transform_2(%arg0: i32) -> (i32, i32) {
    %c0_i32 = arith.constant 0 : i32
    %c0_i32_0 = arith.constant 0 : i32
    %c0_i32_1 = arith.constant 0 : i32
    return %c0_i32, %c0_i32_0 : i32, i32
  }
  func.func @transform_3(%arg0: i32) -> (i32, i32) {
    %c0_i32 = arith.constant 0 : i32
    %c0_i32_0 = arith.constant 0 : i32
    return %c0_i32, %arg0 : i32, i32
  }
}

</mosaic_0001>

<bundles_post_ra>
// kernel: cnn_block_forward.3
= control target key start
LH: loop header
LB: loop body
LE: loop exit
PB: predicated region body
PF: predicated region fallthrough
CT: control target
= control target key end

     0   :  { %v58_v0 = vmov 0   ;;  %s103_s1 = inlined_call_operand.vmem [shape: f32[8,1], index: 1, kind: input, shape index: {}]   ;;  %s104_s2 = inlined_call_operand.vmem [shape: f32[8,1], index: 2, kind: input, shape index: {}]   ;;  %s105_s0 = inlined_call_operand.vmem [shape: bf16[8,512], index: 0, kind: input, shape index: {}]   ;;  %s106_s3 = inlined_call_operand.vmem [shape: f32[8,512], index: 3, kind: output, shape index: {}]  }
   0x1   :  { %57 = vset.pattern.permute.xlu0 %v58_v0  ;;  %v20_v1 = vld [vmem:[%s103_s1] sm:$0xff]  ;;  %v15_v4 = vld [vmem:[%s105_s0 + $0x8] sm:$0xff] }
   0x2   :  { %23 = vperm.xlu0 %57, %v20_v1   ;;  %v30_v2 = vld [vmem:[%s104_s2] sm:$0xff]  ;;  %v18_v7 = vunpack.c.l.bf16 %v15_v4  ;;  %v19_v8 = vunpack.c.h.bf16 %v15_v4 }
   0x3   :  { %v14_v3 = vld [vmem:[%s105_s0] sm:$0xff] }
   0x4   :  { %v16_v5 = vunpack.c.l.bf16 %v14_v3  ;;  %v17_v6 = vunpack.c.h.bf16 %v14_v3 }
   0x6   :  { %33 = vperm.xlu0 %57, %v30_v2  }
  0x7d   :  { %v24_v9 = vpop.permute.xlu0 %23 }
  0x7e   :  { %v26_v10 = vmul.f32 %v24_v9, %v16_v5  ;;  %v27_v11 = vmul.f32 %v24_v9, %v17_v6  ;;  %v28_v12 = vmul.f32 %v24_v9, %v18_v7  ;;  %v29_v13 = vmul.f32 %v24_v9, %v19_v8 }
  0x81   :  { %v34_v14 = vpop.permute.xlu0 %33 }
  0x82   :  { %v36_v15 = vadd.f32 %v34_v14, %v26_v10  ;;  %v37_v16 = vadd.f32 %v34_v14, %v27_v11  ;;  %v38_v17 = vadd.f32 %v34_v14, %v28_v12  ;;  %v39_v18 = vadd.f32 %v34_v14, %v29_v13 }
  0x84   :  { %v40_v19 = vmul.f32 0.1, %v36_v15  ;;  %v41_v20 = vmul.f32 0.1, %v37_v16  ;;  %v42_v21 = vmul.f32 0.1, %v38_v17 }
  0x85   :  { %v43_v22 = vmul.f32 0.1, %v39_v18 }
  0x86   :  { %v44_v23 = vmax.f32 %v36_v15, %v40_v19  ;;  %v45_v24 = vmax.f32 %v37_v16, %v41_v20  ;;  %v46_v25 = vmax.f32 %v38_v17, %v42_v21 }
  0x87   :  { %v47_v26 = vmax.f32 %v39_v18, %v43_v22 }
  0x88   :  { %48 = vst [vmem:[%s106_s3] sm:$0xff] %v44_v23  ;;  %49 = vst [vmem:[%s106_s3 + $0x8] sm:$0xff] %v45_v24 }
  0x89   :  { %50 = vst [vmem:[%s106_s3 + $0x10] sm:$0xff] %v46_v25  ;;  %51 = vst [vmem:[%s106_s3 + $0x18] sm:$0xff] %v47_v26 }

// kernel: cnn_block_forward.2
= control target key start
LH: loop header
LB: loop body
LE: loop exit
PB: predicated region body
PF: predicated region fallthrough
CT: control target
= control target key end

     0   :  { %v1212_v1 = vmov 0   ;;  %vm904_vm0 = vcmask 7168   ;;  %s1508_s0 = inlined_call_operand.vmem [shape: bf16[128,512], index: 0, kind: input, shape index: {}]   ;;  %s1509_s1 = inlined_call_operand.vmem [shape: bf16[128,128], index: 1, kind: input, shape index: {}]   ;;  %s1510_s2 = inlined_call_operand.vmem [shape: bf16[8,512], index: 2, kind: output, shape index: {0}]   ;;  %s1511_s3 = inlined_call_operand.vmem [shape: f32[1,128,1], index: 3, kind: output, shape index: {1}]   ;;  %s1512_s4 = inlined_call_operand.vmem [shape: f32[1,128,1], index: 4, kind: output, shape index: {2}]  }
   0x1   :  { %v1156_v0 = vld [vmem:[%s1508_s0 + $0xe4] ss:$16 sps:$4 sm:$0xff]   ;;  %435 = vmatprep.mubr.bf16.mxu0 %v1212_v1  ;;  %548 = vmatprep.mubr.bf16.mxu1 %v1212_v1  ;;  %v1158_v2 = vld [vmem:[%s1508_s0 + $0xec] ss:$16 sps:$4 sm:$0xff]   ;;  %v1160_v3 = vld [vmem:[%s1508_s0 + $0xe0] ss:$16 sps:$4 sm:$0xff]  }
   0x2   :  { %403 = vmatprep.subr.bf16.mxu0 %v1156_v0  ;;  %v1161_v4 = vld [vmem:[%s1508_s0 + $0xe8] ss:$16 sps:$4 sm:$0xff]   ;;  %516 = vmatprep.subr.bf16.mxu1 %v1158_v2  ;;  %v1162_v5 = vld [vmem:[%s1508_s0 + $0xc4] ss:$16 sps:$4 sm:$0xff]   ;;  %v1164_v6 = vld [vmem:[%s1508_s0 + $0xcc] ss:$16 sps:$4 sm:$0xff]  }
   0x3   :  { %404 = vmatpush1.bf16.msra.mxu0 %v1160_v3  ;;  %517 = vmatpush1.bf16.msra.mxu1 %v1161_v4  ;;  %v1166_v7 = vld [vmem:[%s1508_s0 + $0xc0] ss:$16 sps:$4 sm:$0xff]   ;;  %v1167_v8 = vld [vmem:[%s1508_s0 + $0xc8] ss:$16 sps:$4 sm:$0xff]   ;;  %v1168_v9 = vld [vmem:[%s1508_s0 + $0xa4] ss:$16 sps:$4 sm:$0xff]  }
   0x4   :  { %405 = vmatprep.subr.bf16.mxu0 %v1162_v5  ;;  %518 = vmatprep.subr.bf16.mxu1 %v1164_v6  ;;  %v1170_v10 = vld [vmem:[%s1508_s0 + $0xac] ss:$16 sps:$4 sm:$0xff]   ;;  %v1172_v11 = vld [vmem:[%s1508_s0 + $0xa0] ss:$16 sps:$4 sm:$0xff]   ;;  %v1173_v12 = vld [vmem:[%s1508_s0 + $0xa8] ss:$16 sps:$4 sm:$0xff]  }
   0x5   :  { %v1174_v13 = vld [vmem:[%s1508_s0 + $0x84] ss:$16 sps:$4 sm:$0xff]   ;;  %v1176_v14 = vld [vmem:[%s1508_s0 + $0x8c] ss:$16 sps:$4 sm:$0xff]   ;;  %v1178_v15 = vld [vmem:[%s1508_s0 + $0x80] ss:$16 sps:$4 sm:$0xff]  }
   0x6   :  { %v1179_v16 = vld [vmem:[%s1508_s0 + $0x88] ss:$16 sps:$4 sm:$0xff]   ;;  %v1180_v17 = vld [vmem:[%s1508_s0 + $0x64] ss:$16 sps:$4 sm:$0xff]   ;;  %v1182_v18 = vld [vmem:[%s1508_s0 + $0x6c] ss:$16 sps:$4 sm:$0xff]  }
   0x7   :  { %406 = vmatpush1.bf16.msra.mxu0 %v1166_v7  ;;  %519 = vmatpush1.bf16.msra.mxu1 %v1167_v8  ;;  %v1184_v19 = vld [vmem:[%s1508_s0 + $0x60] ss:$16 sps:$4 sm:$0xff]   ;;  %v1185_v20 = vld [vmem:[%s1508_s0 + $0x68] ss:$16 sps:$4 sm:$0xff]   ;;  %v1186_v21 = vld [vmem:[%s1508_s0 + $0x44] ss:$16 sps:$4 sm:$0xff]  }
   0x8   :  { %407 = vmatprep.subr.bf16.mxu0 %v1168_v9  ;;  %520 = vmatprep.subr.bf16.mxu1 %v1170_v10  ;;  %v1188_v22 = vld [vmem:[%s1508_s0 + $0x4c] ss:$16 sps:$4 sm:$0xff]   ;;  %v1190_v23 = vld [vmem:[%s1508_s0 + $0x40] ss:$16 sps:$4 sm:$0xff]   ;;  %v1191_v24 = vld [vmem:[%s1508_s0 + $0x48] ss:$16 sps:$4 sm:$0xff]  }
   0x9   :  { %v1192_v25 = vld [vmem:[%s1508_s0 + $0x24] ss:$16 sps:$4 sm:$0xff]   ;;  %v1194_v26 = vld [vmem:[%s1508_s0 + $0x2c] ss:$16 sps:$4 sm:$0xff]   ;;  %v1196_v27 = vld [vmem:[%s1508_s0 + $0x20] ss:$16 sps:$4 sm:$0xff]  }
   0xa   :  { %v1197_v28 = vld [vmem:[%s1508_s0 + $0x28] ss:$16 sps:$4 sm:$0xff]   ;;  %v1198_v29 = vld [vmem:[%s1508_s0 + $0x4] ss:$16 sps:$4 sm:$0xff]   ;;  %v1200_v30 = vld [vmem:[%s1508_s0 + $0xc] ss:$16 sps:$4 sm:$0xff]  }
   0xb   :  { %408 = vmatpush1.bf16.msra.mxu0 %v1172_v11  ;;  %521 = vmatpush1.bf16.msra.mxu1 %v1173_v12  ;;  %v1202_v31 = vld [vmem:[%s1508_s0] ss:$16 sps:$4 sm:$0xff]   ;;  %v1203_v32 = vld [vmem:[%s1508_s0 + $0x8] ss:$16 sps:$4 sm:$0xff]  }
   0xc   :  { %409 = vmatprep.subr.bf16.mxu0 %v1174_v13  ;;  %522 = vmatprep.subr.bf16.mxu1 %v1176_v14  ;;  %v1204_v33 = vld [vmem:[%s1509_s1] sm:$0xff]   ;;  %v1205_v34 = vld [vmem:[%s1509_s1 + $0x8] sm:$0xff]   ;;  %v1206_v35 = vld [vmem:[%s1509_s1 + $0x10] sm:$0xff]  }
   0xd   :  { %v1207_v36 = vld [vmem:[%s1509_s1 + $0x18] sm:$0xff]   ;;  %v1208_v37 = vld [vmem:[%s1509_s1 + $0x20] sm:$0xff]   ;;  %v1209_v38 = vld [vmem:[%s1509_s1 + $0x28] sm:$0xff]  }
   0xe   :  { %v1210_v39 = vld [vmem:[%s1509_s1 + $0x30] sm:$0xff]   ;;  %v1211_v40 = vld [vmem:[%s1509_s1 + $0x38] sm:$0xff]  }
   0xf   :  { %410 = vmatpush1.bf16.msra.mxu0 %v1178_v15  ;;  %523 = vmatpush1.bf16.msra.mxu1 %v1179_v16 }
  0x10   :  { %411 = vmatprep.subr.bf16.mxu0 %v1180_v17  ;;  %524 = vmatprep.subr.bf16.mxu1 %v1182_v18 }
  0x13   :  { %412 = vmatpush1.bf16.msra.mxu0 %v1184_v19  ;;  %525 = vmatpush1.bf16.msra.mxu1 %v1185_v20 }
  0x14   :  { %413 = vmatprep.subr.bf16.mxu0 %v1186_v21  ;;  %526 = vmatprep.subr.bf16.mxu1 %v1188_v22 }
  0x17   :  { %414 = vmatpush1.bf16.msra.mxu0 %v1190_v23  ;;  %527 = vmatpush1.bf16.msra.mxu1 %v1191_v24 }
  0x18   :  { %415 = vmatprep.subr.bf16.mxu0 %v1192_v25  ;;  %528 = vmatprep.subr.bf16.mxu1 %v1194_v26 }
  0x1b   :  { %416 = vmatpush1.bf16.msra.mxu0 %v1196_v27  ;;  %529 = vmatpush1.bf16.msra.mxu1 %v1197_v28 }
  0x1c   :  { %417 = vmatprep.subr.bf16.mxu0 %v1198_v29  ;;  %530 = vmatprep.subr.bf16.mxu1 %v1200_v30 }
  0x1f   :  { %418 = vmatpush1.bf16.msra.mxu0 %v1202_v31  ;;  %531 = vmatpush1.bf16.msra.mxu1 %v1203_v32 }
  0x22   :  { %436 = vmatmul.mubr.bf16.vlgmr.msra.gmra.mxu0 %v1204_v33  ;;  %549 = vmatmul.mubr.bf16.vlgmr.msra.gmra.mxu1 %v1204_v33 }
  0x23   :  { %445 = vmatprep.mubr.bf16.mxu0 %v1212_v1  ;;  %558 = vmatprep.mubr.bf16.mxu1 %v1212_v1 }
  0x2a   :  { %446 = vmatmul.mubr.bf16.gmra.mxu0 %v1205_v34  ;;  %559 = vmatmul.mubr.bf16.gmra.mxu1 %v1205_v34 }
  0x2b   :  { %455 = vmatprep.mubr.bf16.mxu0 %v1212_v1  ;;  %568 = vmatprep.mubr.bf16.mxu1 %v1212_v1 }
  0x32   :  { %456 = vmatmul.mubr.bf16.gmra.mxu0 %v1206_v35  ;;  %569 = vmatmul.mubr.bf16.gmra.mxu1 %v1206_v35 }
  0x33   :  { %465 = vmatprep.mubr.bf16.mxu0 %v1212_v1  ;;  %578 = vmatprep.mubr.bf16.mxu1 %v1212_v1 }
  0x3a   :  { %466 = vmatmul.mubr.bf16.gmra.mxu0 %v1207_v36  ;;  %579 = vmatmul.mubr.bf16.gmra.mxu1 %v1207_v36 }
  0x3b   :  { %475 = vmatprep.mubr.bf16.mxu0 %v1212_v1  ;;  %588 = vmatprep.mubr.bf16.mxu1 %v1212_v1 }
  0x42   :  { %476 = vmatmul.mubr.bf16.gmra.mxu0 %v1208_v37  ;;  %589 = vmatmul.mubr.bf16.gmra.mxu1 %v1208_v37 }
  0x43   :  { %485 = vmatprep.mubr.bf16.mxu0 %v1212_v1  ;;  %598 = vmatprep.mubr.bf16.mxu1 %v1212_v1 }
  0x4a   :  { %486 = vmatmul.mubr.bf16.gmra.mxu0 %v1209_v38  ;;  %599 = vmatmul.mubr.bf16.gmra.mxu1 %v1209_v38 }
  0x4b   :  { %495 = vmatprep.mubr.bf16.mxu0 %v1212_v1  ;;  %608 = vmatprep.mubr.bf16.mxu1 %v1212_v1 }
  0x52   :  { %496 = vmatmul.mubr.bf16.gmra.mxu0 %v1210_v39  ;;  %609 = vmatmul.mubr.bf16.gmra.mxu1 %v1210_v39 }
  0x53   :  { %505 = vmatprep.mubr.bf16.mxu0 %v1212_v1  ;;  %618 = vmatprep.mubr.bf16.mxu1 %v1212_v1 }
  0x5a   :  { %506 = vmatmul.mubr.bf16.gmra.mxu0 %v1211_v40  ;;  %619 = vmatmul.mubr.bf16.gmra.mxu1 %v1211_v40 }
  0xe2   :  { %v437_v41 = vpop.f32.mrf.mxu0  ;;  %v550_v42 = vpop.f32.mrf.mxu1 }
  0xe3   :  { %v921_v43 = vmul.f32 %v437_v41, %v437_v41  ;;  %v923_v50 = vmul.f32 %v550_v42, %v550_v42 }
  0xe4   :  { %v439_v44 = vpop.f32.mrf.mxu0  ;;  %v552_v45 = vpop.f32.mrf.mxu1 }
  0xe5   :  { %v824_v46 = vadd.f32 %v439_v44, %v437_v41  ;;  %v922_v47 = vmul.f32 %v439_v44, %v439_v44  ;;  %v1153_v48 = vpack.c.bf16 %v439_v44, %v437_v41  ;;  %v1154_v49 = vpack.c.bf16 %v552_v45, %v550_v42 }
  0xe6   :  { %v441_v51 = vpop.f32.mrf.mxu0  ;;  %v554_v52 = vpop.f32.mrf.mxu1  ;;  %v924_v3 = vmul.f32 %v552_v45, %v552_v45 }
  0xe7   :  { %1097 = vst [vmem:[%s1510_s2] sm:$0xff] %v1153_v48  ;;  %1098 = vst [vmem:[%s1510_s2 + $0x8] sm:$0xff] %v1154_v49  ;;  %v825_v53 = vadd.f32 %v824_v46, %v550_v42  ;;  %v985_v54 = vadd.f32 %v922_v47, %v921_v43  ;;  %v925_v57 = vmul.f32 %v441_v51, %v441_v51 }
  0xe8   :  { %v443_v55 = vpop.f32.mrf.mxu0  ;;  %v556_v56 = vpop.f32.mrf.mxu1  ;;  %v927_v0 = vmul.f32 %v554_v52, %v554_v52 }
  0xe9   :  { %v829_v58 = vadd.f32 %v443_v55, %v441_v51  ;;  %v926_v59 = vmul.f32 %v443_v55, %v443_v55  ;;  %v826_v60 = vadd.f32 %v825_v53, %v552_v45  ;;  %v986_v63 = vadd.f32 %v985_v54, %v923_v50 }
  0xea   :  { %v447_v61 = vpop.f32.mrf.mxu0  ;;  %v560_v62 = vpop.f32.mrf.mxu1  ;;  %v928_v4 = vmul.f32 %v556_v56, %v556_v56 }
  0xeb   :  { %v990_v1 = vadd.f32 %v926_v59, %v925_v57  ;;  %v929_v2 = vmul.f32 %v447_v61, %v447_v61  ;;  %827 = vadd.xlane.f32.xlu0 %v826_v60  ;;  %v931_v5 = vmul.f32 %v560_v62, %v560_v62  ;;  %v830_v8 = vadd.f32 %v829_v58, %v554_v52 }
  0xec   :  { %v449_v6 = vpop.f32.mrf.mxu0  ;;  %v562_v7 = vpop.f32.mrf.mxu1  ;;  %v987_v11 = vadd.f32 %v986_v63, %v924_v3 }
  0xed   :  { %v834_v9 = vadd.f32 %v449_v6, %v447_v61  ;;  %v930_v10 = vmul.f32 %v449_v6, %v449_v6  ;;  %v991_v12 = vadd.f32 %v990_v1, %v927_v0  ;;  %v932_v17 = vmul.f32 %v562_v7, %v562_v7 }
  0xee   :  { %v451_v13 = vpop.f32.mrf.mxu0  ;;  %v564_v14 = vpop.f32.mrf.mxu1  ;;  %v831_v20 = vadd.f32 %v830_v8, %v556_v56 }
  0xef   :  { %v995_v15 = vadd.f32 %v930_v10, %v929_v2  ;;  %988 = vadd.xlane.f32.xlu0 %v987_v11  ;;  %v992_v16 = vadd.f32 %v991_v12, %v928_v4  ;;  %v835_v21 = vadd.f32 %v834_v9, %v560_v62  ;;  %v933_v22 = vmul.f32 %v451_v13, %v451_v13 }
  0xf0   :  { %v453_v18 = vpop.f32.mrf.mxu0  ;;  %v566_v19 = vpop.f32.mrf.mxu1  ;;  %v935_v34 = vmul.f32 %v564_v14, %v564_v14 }
  0xf1   :  { %v839_v23 = vadd.f32 %v453_v18, %v451_v13  ;;  %v934_v24 = vmul.f32 %v453_v18, %v453_v18  ;;  %993 = vadd.xlane.f32.xlu1 %v992_v16  ;;  %v996_v25 = vadd.f32 %v995_v15, %v931_v5  ;;  %v836_v30 = vadd.f32 %v835_v21, %v562_v7 }
  0xf2   :  { %v457_v26 = vpop.f32.mrf.mxu0  ;;  %v570_v27 = vpop.f32.mrf.mxu1  ;;  %v936_v45 = vmul.f32 %v566_v19, %v566_v19 }
  0xf3   :  { %v1000_v28 = vadd.f32 %v934_v24, %v933_v22  ;;  %v937_v29 = vmul.f32 %v457_v26, %v457_v26  ;;  %832 = vadd.xlane.f32.xlu0 %v831_v20  ;;  %v840_v33 = vadd.f32 %v839_v23, %v564_v14  ;;  %v997_v37 = vadd.f32 %v996_v25, %v932_v17 }
  0xf4   :  { %v459_v31 = vpop.f32.mrf.mxu0  ;;  %v572_v32 = vpop.f32.mrf.mxu1  ;;  %v939_v38 = vmul.f32 %v570_v27, %v570_v27 }
  0xf5   :  { %v844_v35 = vadd.f32 %v459_v31, %v457_v26  ;;  %v938_v36 = vmul.f32 %v459_v31, %v459_v31  ;;  %837 = vadd.xlane.f32.xlu1 %v836_v30  ;;  %v841_v42 = vadd.f32 %v840_v33, %v566_v19  ;;  %v1001_v44 = vadd.f32 %v1000_v28, %v935_v34 }
  0xf6   :  { %v461_v39 = vpop.f32.mrf.mxu0  ;;  %v574_v40 = vpop.f32.mrf.mxu1  ;;  %v940_v46 = vmul.f32 %v572_v32, %v572_v32 }
  0xf7   :  { %v1005_v41 = vadd.f32 %v938_v36, %v937_v29  ;;  %998 = vadd.xlane.f32.xlu0 %v997_v37  ;;  %v845_v43 = vadd.f32 %v844_v35, %v570_v27  ;;  %v941_v49 = vmul.f32 %v461_v39, %v461_v39  ;;  %v1002_v58 = vadd.f32 %v1001_v44, %v936_v45 }
  0xf8   :  { %v463_v47 = vpop.f32.mrf.mxu0  ;;  %v576_v48 = vpop.f32.mrf.mxu1  ;;  %v943_v62 = vmul.f32 %v574_v40, %v574_v40 }
  0xf9   :  { %v849_v50 = vadd.f32 %v463_v47, %v461_v39  ;;  %v942_v51 = vmul.f32 %v463_v47, %v463_v47  ;;  %842 = vadd.xlane.f32.xlu1 %v841_v42  ;;  %v846_v52 = vadd.f32 %v845_v43, %v572_v32  ;;  %v1006_v55 = vadd.f32 %v1005_v41, %v939_v38 }
  0xfa   :  { %v467_v53 = vpop.f32.mrf.mxu0  ;;  %v580_v54 = vpop.f32.mrf.mxu1  ;;  %v944_v9 = vmul.f32 %v576_v48, %v576_v48 }
  0xfb   :  { %v1010_v56 = vadd.f32 %v942_v51, %v941_v49  ;;  %v945_v57 = vmul.f32 %v467_v53, %v467_v53  ;;  %847 = vadd.xlane.f32.xlu0 %v846_v52  ;;  %v850_v59 = vadd.f32 %v849_v50, %v574_v40  ;;  %v1007_v1 = vadd.f32 %v1006_v55, %v940_v46 }
  0xfc   :  { %v469_v60 = vpop.f32.mrf.mxu0  ;;  %v582_v61 = vpop.f32.mrf.mxu1  ;;  %v947_v2 = vmul.f32 %v580_v54, %v580_v54 }
  0xfd   :  { %v854_v63 = vadd.f32 %v469_v60, %v467_v53  ;;  %v946_v0 = vmul.f32 %v469_v60, %v469_v60  ;;  %1003 = vadd.xlane.f32.xlu1 %v1002_v58  ;;  %v851_v6 = vadd.f32 %v850_v59, %v576_v48  ;;  %v1011_v8 = vadd.f32 %v1010_v56, %v943_v62 }
  0xfe   :  { %v471_v3 = vpop.f32.mrf.mxu0  ;;  %v584_v4 = vpop.f32.mrf.mxu1  ;;  %v948_v10 = vmul.f32 %v582_v61, %v582_v61 }
  0xff   :  { %v1015_v5 = vadd.f32 %v946_v0, %v945_v57  ;;  %1008 = vadd.xlane.f32.xlu0 %v1007_v1  ;;  %v855_v7 = vadd.f32 %v854_v63, %v580_v54  ;;  %v949_v13 = vmul.f32 %v471_v3, %v471_v3  ;;  %v1012_v22 = vadd.f32 %v1011_v8, %v944_v9 }
 0x100   :  { %v473_v11 = vpop.f32.mrf.mxu0  ;;  %v586_v12 = vpop.f32.mrf.mxu1  ;;  %v951_v26 = vmul.f32 %v584_v4, %v584_v4 }
 0x101   :  { %v859_v14 = vadd.f32 %v473_v11, %v471_v3  ;;  %v950_v15 = vmul.f32 %v473_v11, %v473_v11  ;;  %852 = vadd.xlane.f32.xlu1 %v851_v6  ;;  %v856_v16 = vadd.f32 %v855_v7, %v582_v61  ;;  %v1016_v19 = vadd.f32 %v1015_v5, %v947_v2 }
 0x102   :  { %v477_v17 = vpop.f32.mrf.mxu0  ;;  %v590_v18 = vpop.f32.mrf.mxu1  ;;  %v952_v37 = vmul.f32 %v586_v12, %v586_v12 }
 0x103   :  { %v1020_v20 = vadd.f32 %v950_v15, %v949_v13  ;;  %v953_v21 = vmul.f32 %v477_v17, %v477_v17  ;;  %857 = vadd.xlane.f32.xlu0 %v856_v16  ;;  %v860_v23 = vadd.f32 %v859_v14, %v584_v4  ;;  %v1017_v29 = vadd.f32 %v1016_v19, %v948_v10 }
 0x104   :  { %v479_v24 = vpop.f32.mrf.mxu0  ;;  %v592_v25 = vpop.f32.mrf.mxu1  ;;  %v955_v30 = vmul.f32 %v590_v18, %v590_v18 }
 0x105   :  { %v864_v27 = vadd.f32 %v479_v24, %v477_v17  ;;  %v954_v28 = vmul.f32 %v479_v24, %v479_v24  ;;  %1013 = vadd.xlane.f32.xlu1 %v1012_v22  ;;  %v861_v34 = vadd.f32 %v860_v23, %v586_v12  ;;  %v1021_v36 = vadd.f32 %v1020_v20, %v951_v26 }
 0x106   :  { %v481_v31 = vpop.f32.mrf.mxu0  ;;  %v594_v32 = vpop.f32.mrf.mxu1  ;;  %v956_v38 = vmul.f32 %v592_v25, %v592_v25 }
 0x107   :  { %v1025_v33 = vadd.f32 %v954_v28, %v953_v21  ;;  %1018 = vadd.xlane.f32.xlu0 %v1017_v29  ;;  %v865_v35 = vadd.f32 %v864_v27, %v590_v18  ;;  %v957_v41 = vmul.f32 %v481_v31, %v481_v31  ;;  %v1022_v50 = vadd.f32 %v1021_v36, %v952_v37 }
 0x108   :  { %v483_v39 = vpop.f32.mrf.mxu0  ;;  %v596_v40 = vpop.f32.mrf.mxu1  ;;  %v959_v54 = vmul.f32 %v594_v32, %v594_v32 }
 0x109   :  { %v869_v42 = vadd.f32 %v483_v39, %v481_v31  ;;  %v958_v43 = vmul.f32 %v483_v39, %v483_v39  ;;  %862 = vadd.xlane.f32.xlu1 %v861_v34  ;;  %v866_v44 = vadd.f32 %v865_v35, %v592_v25  ;;  %v1026_v47 = vadd.f32 %v1025_v33, %v955_v30 }
 0x10a   :  { %v487_v45 = vpop.f32.mrf.mxu0  ;;  %v600_v46 = vpop.f32.mrf.mxu1  ;;  %v960_v1 = vmul.f32 %v596_v40, %v596_v40 }
 0x10b   :  { %v1030_v48 = vadd.f32 %v958_v43, %v957_v41  ;;  %v961_v49 = vmul.f32 %v487_v45, %v487_v45  ;;  %867 = vadd.xlane.f32.xlu0 %v866_v44  ;;  %v870_v51 = vadd.f32 %v869_v42, %v594_v32  ;;  %v1027_v57 = vadd.f32 %v1026_v47, %v956_v38 }
 0x10c   :  { %v489_v52 = vpop.f32.mrf.mxu0  ;;  %v602_v53 = vpop.f32.mrf.mxu1  ;;  %v963_v58 = vmul.f32 %v600_v46, %v600_v46 }
 0x10d   :  { %v874_v55 = vadd.f32 %v489_v52, %v487_v45  ;;  %v962_v56 = vmul.f32 %v489_v52, %v489_v52  ;;  %1023 = vadd.xlane.f32.xlu1 %v1022_v50  ;;  %v871_v62 = vadd.f32 %v870_v51, %v596_v40  ;;  %v1031_v0 = vadd.f32 %v1030_v48, %v959_v54 }
 0x10e   :  { %v491_v59 = vpop.f32.mrf.mxu0  ;;  %v604_v60 = vpop.f32.mrf.mxu1  ;;  %v964_v2 = vmul.f32 %v602_v53, %v602_v53 }
 0x10f   :  { %v1035_v61 = vadd.f32 %v962_v56, %v961_v49  ;;  %1028 = vadd.xlane.f32.xlu0 %v1027_v57  ;;  %v875_v63 = vadd.f32 %v874_v55, %v600_v46  ;;  %v965_v5 = vmul.f32 %v491_v59, %v491_v59  ;;  %v1032_v14 = vadd.f32 %v1031_v0, %v960_v1 }
 0x110   :  { %v493_v3 = vpop.f32.mrf.mxu0  ;;  %v606_v4 = vpop.f32.mrf.mxu1  ;;  %v967_v18 = vmul.f32 %v604_v60, %v604_v60 }
 0x111   :  { %v879_v6 = vadd.f32 %v493_v3, %v491_v59  ;;  %v966_v7 = vmul.f32 %v493_v3, %v493_v3  ;;  %872 = vadd.xlane.f32.xlu1 %v871_v62  ;;  %v876_v8 = vadd.f32 %v875_v63, %v602_v53  ;;  %v1036_v11 = vadd.f32 %v1035_v61, %v963_v58 }
 0x112   :  { %v497_v9 = vpop.f32.mrf.mxu0  ;;  %v610_v10 = vpop.f32.mrf.mxu1  ;;  %v968_v29 = vmul.f32 %v606_v4, %v606_v4 }
 0x113   :  { %v1040_v12 = vadd.f32 %v966_v7, %v965_v5  ;;  %v969_v13 = vmul.f32 %v497_v9, %v497_v9  ;;  %877 = vadd.xlane.f32.xlu0 %v876_v8  ;;  %v880_v15 = vadd.f32 %v879_v6, %v604_v60  ;;  %v1037_v21 = vadd.f32 %v1036_v11, %v964_v2 }
 0x114   :  { %v499_v16 = vpop.f32.mrf.mxu0  ;;  %v612_v17 = vpop.f32.mrf.mxu1  ;;  %v971_v22 = vmul.f32 %v610_v10, %v610_v10 }
 0x115   :  { %v884_v19 = vadd.f32 %v499_v16, %v497_v9  ;;  %v970_v20 = vmul.f32 %v499_v16, %v499_v16  ;;  %1033 = vadd.xlane.f32.xlu1 %v1032_v14  ;;  %v881_v26 = vadd.f32 %v880_v15, %v606_v4  ;;  %v1041_v28 = vadd.f32 %v1040_v12, %v967_v18 }
 0x116   :  { %v501_v23 = vpop.f32.mrf.mxu0  ;;  %v614_v24 = vpop.f32.mrf.mxu1  ;;  %v972_v30 = vmul.f32 %v612_v17, %v612_v17 }
 0x117   :  { %v1045_v25 = vadd.f32 %v970_v20, %v969_v13  ;;  %1038 = vadd.xlane.f32.xlu0 %v1037_v21  ;;  %v885_v27 = vadd.f32 %v884_v19, %v610_v10  ;;  %v973_v33 = vmul.f32 %v501_v23, %v501_v23  ;;  %v1042_v42 = vadd.f32 %v1041_v28, %v968_v29 }
 0x118   :  { %v503_v31 = vpop.f32.mrf.mxu0  ;;  %v616_v32 = vpop.f32.mrf.mxu1  ;;  %v975_v45 = vmul.f32 %v614_v24, %v614_v24 }
 0x119   :  { %v889_v34 = vadd.f32 %v503_v31, %v501_v23  ;;  %v974_v35 = vmul.f32 %v503_v31, %v503_v31  ;;  %882 = vadd.xlane.f32.xlu1 %v881_v26  ;;  %v886_v36 = vadd.f32 %v885_v27, %v612_v17  ;;  %v1046_v39 = vadd.f32 %v1045_v25, %v971_v22 }
 0x11a   :  { %v507_v37 = vpop.f32.mrf.mxu0  ;;  %v620_v38 = vpop.f32.mrf.mxu1  ;;  %v976_v56 = vmul.f32 %v616_v32, %v616_v32 }
 0x11b   :  { %v1050_v40 = vadd.f32 %v974_v35, %v973_v33  ;;  %v977_v41 = vmul.f32 %v507_v37, %v507_v37  ;;  %887 = vadd.xlane.f32.xlu0 %v886_v36  ;;  %v890_v43 = vadd.f32 %v889_v34, %v614_v24  ;;  %v1047_v48 = vadd.f32 %v1046_v39, %v972_v30 }
 0x11c   :  { %v509_v44 = vpop.f32.mrf.mxu0  ;;  %v979_v49 = vmul.f32 %v620_v38, %v620_v38  ;;  %v622_v50 = vpop.f32.mrf.mxu1 }
 0x11d   :  { %v894_v46 = vadd.f32 %v509_v44, %v507_v37  ;;  %v978_v47 = vmul.f32 %v509_v44, %v509_v44  ;;  %1043 = vadd.xlane.f32.xlu1 %v1042_v42  ;;  %v891_v53 = vadd.f32 %v890_v43, %v616_v32  ;;  %v1051_v55 = vadd.f32 %v1050_v40, %v975_v45 }
 0x11e   :  { %v511_v51 = vpop.f32.mrf.mxu0  ;;  %v980_v57 = vmul.f32 %v622_v50, %v622_v50  ;;  %v624_v63 = vpop.f32.mrf.mxu1 }
 0x11f   :  { %v1055_v52 = vadd.f32 %v978_v47, %v977_v41  ;;  %1048 = vadd.xlane.f32.xlu0 %v1047_v48  ;;  %v895_v54 = vadd.f32 %v894_v46, %v620_v38  ;;  %v981_v59 = vmul.f32 %v511_v51, %v511_v51  ;;  %v1052_v3 = vadd.f32 %v1051_v55, %v976_v56 }
 0x120   :  { %v513_v58 = vpop.f32.mrf.mxu0  ;;  %v983_v4 = vmul.f32 %v624_v63, %v624_v63  ;;  %v626_v6 = vpop.f32.mrf.mxu1 }
 0x121   :  { %v899_v60 = vadd.f32 %v513_v58, %v511_v51  ;;  %v982_v61 = vmul.f32 %v513_v58, %v513_v58  ;;  %892 = vadd.xlane.f32.xlu1 %v891_v53  ;;  %v896_v62 = vadd.f32 %v895_v54, %v622_v50  ;;  %v1056_v0 = vadd.f32 %v1055_v52, %v979_v49 }
 0x122   :  { %v984_v9 = vmul.f32 %v626_v6, %v626_v6 }
 0x123   :  { %v1060_v1 = vadd.f32 %v982_v61, %v981_v59  ;;  %v900_v2 = vadd.f32 %v899_v60, %v624_v63  ;;  %897 = vadd.xlane.f32.xlu0 %v896_v62  ;;  %v1057_v5 = vadd.f32 %v1056_v0, %v980_v57 }
 0x125   :  { %1053 = vadd.xlane.f32.xlu1 %v1052_v3  ;;  %v901_v7 = vadd.f32 %v900_v2, %v626_v6  ;;  %v1061_v8 = vadd.f32 %v1060_v1, %v983_v4 }
 0x127   :  { %1058 = vadd.xlane.f32.xlu0 %v1057_v5  ;;  %v1062_v10 = vadd.f32 %v1061_v8, %v984_v9 }
 0x129   :  { %902 = vadd.xlane.f32.xlu1 %v901_v7 }
 0x12d   :  { %1063 = vadd.xlane.f32.xlu1 %v1062_v10 }
 0x174   :  { %v828_v11 = vpop.xlane.xlu0 %827 }
 0x175   :  { %905 = vst.msk [vmem:[%s1511_s3] sm:$0xff] %vm904_vm0, %v828_v11 }
 0x178   :  { %v989_v12 = vpop.xlane.xlu0 %988 }
 0x179   :  { %1065 = vst.msk [vmem:[%s1512_s4] sm:$0xff] %vm904_vm0, %v989_v12 }
 0x17a   :  { %v994_v13 = vpop.xlane.xlu1 %993 }
 0x17b   :  { %1066 = vst.msk [vmem:[%s1512_s4 + $0x8] sm:$0xff] %vm904_vm0, %v994_v13 }
 0x17c   :  { %v833_v14 = vpop.xlane.xlu0 %832 }
 0x17d   :  { %906 = vst.msk [vmem:[%s1511_s3 + $0x8] sm:$0xff] %vm904_vm0, %v833_v14 }
 0x17e   :  { %v838_v15 = vpop.xlane.xlu1 %837 }
 0x17f   :  { %907 = vst.msk [vmem:[%s1511_s3 + $0x10] sm:$0xff] %vm904_vm0, %v838_v15 }
 0x180   :  { %v999_v16 = vpop.xlane.xlu0 %998 }
 0x181   :  { %1067 = vst.msk [vmem:[%s1512_s4 + $0x10] sm:$0xff] %vm904_vm0, %v999_v16 }
 0x182   :  { %v843_v17 = vpop.xlane.xlu1 %842 }
 0x183   :  { %908 = vst.msk [vmem:[%s1511_s3 + $0x18] sm:$0xff] %vm904_vm0, %v843_v17 }
 0x184   :  { %v848_v18 = vpop.xlane.xlu0 %847 }
 0x185   :  { %909 = vst.msk [vmem:[%s1511_s3 + $0x20] sm:$0xff] %vm904_vm0, %v848_v18 }
 0x186   :  { %v1004_v19 = vpop.xlane.xlu1 %1003 }
 0x187   :  { %1068 = vst.msk [vmem:[%s1512_s4 + $0x18] sm:$0xff] %vm904_vm0, %v1004_v19 }
 0x188   :  { %v1009_v20 = vpop.xlane.xlu0 %1008 }
 0x189   :  { %1069 = vst.msk [vmem:[%s1512_s4 + $0x20] sm:$0xff] %vm904_vm0, %v1009_v20 }
 0x18a   :  { %v853_v21 = vpop.xlane.xlu1 %852 }
 0x18b   :  { %910 = vst.msk [vmem:[%s1511_s3 + $0x28] sm:$0xff] %vm904_vm0, %v853_v21 }
 0x18c   :  { %v858_v22 = vpop.xlane.xlu0 %857 }
 0x18d   :  { %911 = vst.msk [vmem:[%s1511_s3 + $0x30] sm:$0xff] %vm904_vm0, %v858_v22 }
 0x18e   :  { %v1014_v23 = vpop.xlane.xlu1 %1013 }
 0x18f   :  { %1070 = vst.msk [vmem:[%s1512_s4 + $0x28] sm:$0xff] %vm904_vm0, %v1014_v23 }
 0x190   :  { %v1019_v24 = vpop.xlane.xlu0 %1018 }
 0x191   :  { %1071 = vst.msk [vmem:[%s1512_s4 + $0x30] sm:$0xff] %vm904_vm0, %v1019_v24 }
 0x192   :  { %v863_v25 = vpop.xlane.xlu1 %862 }
 0x193   :  { %912 = vst.msk [vmem:[%s1511_s3 + $0x38] sm:$0xff] %vm904_vm0, %v863_v25 }
 0x194   :  { %v868_v26 = vpop.xlane.xlu0 %867 }
 0x195   :  { %913 = vst.msk [vmem:[%s1511_s3 + $0x40] sm:$0xff] %vm904_vm0, %v868_v26 }
 0x196   :  { %v1024_v27 = vpop.xlane.xlu1 %1023 }
 0x197   :  { %1072 = vst.msk [vmem:[%s1512_s4 + $0x38] sm:$0xff] %vm904_vm0, %v1024_v27 }
 0x198   :  { %v1029_v28 = vpop.xlane.xlu0 %1028 }
 0x199   :  { %1073 = vst.msk [vmem:[%s1512_s4 + $0x40] sm:$0xff] %vm904_vm0, %v1029_v28 }
 0x19a   :  { %v873_v29 = vpop.xlane.xlu1 %872 }
 0x19b   :  { %914 = vst.msk [vmem:[%s1511_s3 + $0x48] sm:$0xff] %vm904_vm0, %v873_v29 }
 0x19c   :  { %v878_v30 = vpop.xlane.xlu0 %877 }
 0x19d   :  { %915 = vst.msk [vmem:[%s1511_s3 + $0x50] sm:$0xff] %vm904_vm0, %v878_v30 }
 0x19e   :  { %v1034_v31 = vpop.xlane.xlu1 %1033 }
 0x19f   :  { %1074 = vst.msk [vmem:[%s1512_s4 + $0x48] sm:$0xff] %vm904_vm0, %v1034_v31 }
 0x1a0   :  { %v1039_v32 = vpop.xlane.xlu0 %1038 }
 0x1a1   :  { %1075 = vst.msk [vmem:[%s1512_s4 + $0x50] sm:$0xff] %vm904_vm0, %v1039_v32 }
 0x1a2   :  { %v883_v33 = vpop.xlane.xlu1 %882 }
 0x1a3   :  { %916 = vst.msk [vmem:[%s1511_s3 + $0x58] sm:$0xff] %vm904_vm0, %v883_v33 }
 0x1a4   :  { %v888_v34 = vpop.xlane.xlu0 %887 }
 0x1a5   :  { %917 = vst.msk [vmem:[%s1511_s3 + $0x60] sm:$0xff] %vm904_vm0, %v888_v34 }
 0x1a6   :  { %v1044_v35 = vpop.xlane.xlu1 %1043 }
 0x1a7   :  { %1076 = vst.msk [vmem:[%s1512_s4 + $0x58] sm:$0xff] %vm904_vm0, %v1044_v35 }
 0x1a8   :  { %v1049_v36 = vpop.xlane.xlu0 %1048 }
 0x1a9   :  { %1077 = vst.msk [vmem:[%s1512_s4 + $0x60] sm:$0xff] %vm904_vm0, %v1049_v36 }
 0x1aa   :  { %v893_v37 = vpop.xlane.xlu1 %892 }
 0x1ab   :  { %918 = vst.msk [vmem:[%s1511_s3 + $0x68] sm:$0xff] %vm904_vm0, %v893_v37 }
 0x1ac   :  { %v898_v38 = vpop.xlane.xlu0 %897 }
 0x1ad   :  { %919 = vst.msk [vmem:[%s1511_s3 + $0x70] sm:$0xff] %vm904_vm0, %v898_v38 }
 0x1ae   :  { %v1054_v39 = vpop.xlane.xlu1 %1053 }
 0x1af   :  { %1078 = vst.msk [vmem:[%s1512_s4 + $0x68] sm:$0xff] %vm904_vm0, %v1054_v39 }
 0x1b0   :  { %v1059_v40 = vpop.xlane.xlu0 %1058 }
 0x1b1   :  { %1079 = vst.msk [vmem:[%s1512_s4 + $0x70] sm:$0xff] %vm904_vm0, %v1059_v40 }
 0x1b2   :  { %v903_v41 = vpop.xlane.xlu1 %902 }
 0x1b3   :  { %920 = vst.msk [vmem:[%s1511_s3 + $0x78] sm:$0xff] %vm904_vm0, %v903_v41 }
 0x1b6   :  { %v1064_v42 = vpop.xlane.xlu1 %1063 }
 0x1b7   :  { %1080 = vst.msk [vmem:[%s1512_s4 + $0x78] sm:$0xff] %vm904_vm0, %v1064_v42 }

</bundles_post_ra>
